<compile_context>
chip_gen: v6e
topology: v6e:2x2x1
jax: 0.10.0
libtpu: 0.0.40
codegen_flags: <defaults>
</compile_context>

<pallas_src>
import jax
import jax.numpy as jnp
from jax.experimental import pallas as pl
from jax.experimental.pallas import tpu as pltpu

_LANES = 128
_MAX_BLOCK_ROWS = 2048  # 2048*128*4B = 1 MiB per f32 tile


def _round_up(n, m):
    return ((n + m - 1) // m) * m


def _choose_block_rows(rows):
    """Pick a block size (rows per grid step)."""
    if rows < 16:
        # Single grid step, block == full array extent (always legal).
        return rows
    # >= 2 grid steps so the "parallel" axis can split across TensorCores;
    # block_rows is a multiple of 8 so partial trailing blocks are legal.
    half = _round_up(pl.cdiv(rows, 2), 8)
    return min(_MAX_BLOCK_ROWS, half)


def _linear_scale_kernel(w_ref, b_ref, x_ref, o_ref):
    # w_ref/b_ref: (1,1) f32 scalars in SMEM, already pre-scaled by 2.
    # x_ref/o_ref: (block_rows, 128) lane-dense VMEM tiles (input dtype / output dtype).
    w = w_ref[0, 0]
    b = b_ref[0, 0]
    x = x_ref[...].astype(jnp.float32)
    o_ref[...] = (x * w + b).astype(o_ref.dtype)


def simple_model_forward(x, weight, bias):
    """x: (batch, 1). weight: (1, 1) (PyTorch Linear.weight). bias: (1,).

    Returns 2 * (x @ weight.T + bias), shape (batch, 1), dtype of x.
    """
    batch = x.shape[0]
    orig_dtype = x.dtype

    # Fold the 2x scale into the parameters (one fewer VALU op per vreg).
    w2 = (2.0 * weight.reshape(1, 1)).astype(jnp.float32)
    b2 = (2.0 * bias.reshape(1, 1)).astype(jnp.float32)

    # Lane-dense slab in the ORIGINAL dtype (cast happens in-kernel).
    x_flat = x.reshape(-1)

    if batch % _LANES == 0:
        # Fast path: metadata-only reshape, no pad, no trailing slice.
        rows = batch // _LANES
        x_slab = x_flat.reshape(rows, _LANES)
        padded = True if False else False  # explicit: no padding on this path
    else:
        # Slow path: pad flat length to rows*128 with rows a multiple of 8 only
        # (NOT rounded up to block_rows), slice padding off at the end.
        rows = max(8, _round_up(pl.cdiv(batch, _LANES), 8))
        x_slab = jnp.pad(x_flat, (0, rows * _LANES - batch)).reshape(rows, _LANES)
        padded = True

    block_rows = _choose_block_rows(rows)
    grid = (pl.cdiv(rows, block_rows),)

    elems = rows * _LANES
    in_bytes = elems * jnp.dtype(x.dtype).itemsize
    out_bytes = elems * jnp.dtype(orig_dtype).itemsize

    out_slab = pl.pallas_call(
        _linear_scale_kernel,
        out_shape=jax.ShapeDtypeStruct((rows, _LANES), orig_dtype),
        grid=grid,
        in_specs=[
            pl.BlockSpec((1, 1), lambda i: (0, 0), memory_space=pltpu.SMEM),  # 2*w
            pl.BlockSpec((1, 1), lambda i: (0, 0), memory_space=pltpu.SMEM),  # 2*b
            pl.BlockSpec((block_rows, _LANES), lambda i: (i, 0)),             # x slab
        ],
        out_specs=pl.BlockSpec((block_rows, _LANES), lambda i: (i, 0)),
        compiler_params=pltpu.CompilerParams(
            dimension_semantics=("parallel",),
        ),
        cost_estimate=pl.CostEstimate(
            flops=2 * elems,
            transcendentals=0,
            bytes_accessed=in_bytes + out_bytes,
        ),
    )(w2, b2, x_slab)

    if padded:
        return out_slab.reshape(-1)[:batch].reshape(batch, 1)
    return out_slab.reshape(batch, 1)


if __name__ == "__main__":
    key = jax.random.PRNGKey(0)
    kw, kb, kx = jax.random.split(key, 3)

    # Deterministic parameter init (mimicking nn.Linear's uniform bound for
    # in_features=1).
    weight = jax.random.uniform(kw, (1, 1), minval=-1.0, maxval=1.0, dtype=jnp.float32)
    bias = jax.random.uniform(kb, (1,), minval=-1.0, maxval=1.0, dtype=jnp.float32)

    ok = True
    # batch=8    -> slow path (pad + slice), single full-extent block
    # batch=256  -> fast path (no pad/slice), single full-extent block
    # batch=2560 -> fast path, 2 grid steps with a masked partial trailing block
    for batch in (8, 256, 2560):
        xk = jax.random.fold_in(kx, batch)
        x = jax.random.normal(xk, (batch, 1), dtype=jnp.float32)

        out = simple_model_forward(x, weight, bias)
        out = jax.block_until_ready(out)

        ref = 2.0 * (x @ weight.T + bias)
        assert out.shape == (batch, 1)
        if not jnp.allclose(out, ref, atol=1e-6):
            ok = False
            print(f"mismatch vs reference at batch={batch}")

    if ok:
        print("KERNEL_OK")
</pallas_src>

<mosaic_0001>
module attributes {stable_mosaic.version = 11 : i64} {
  func.func @_linear_scale_kernel(%arg0: i32, %arg1: memref<1x1xf32, #tpu.memory_space<smem>>, %arg2: memref<1x1xf32, #tpu.memory_space<smem>>, %arg3: memref<8x128xf32, #tpu.memory_space<vmem>>, %arg4: memref<8x128xf32, #tpu.memory_space<vmem>>) attributes {dimension_semantics = [#tpu.dimension_semantics<parallel>], iteration_bounds = array<i64: 1>, scalar_prefetch = 0 : i64, scratch_operands = 0 : i64, tpu.core_type = #tpu.core_type<tc>, window_params = [{transform_indices = @transform_0, window_bounds = array<i64: 1, 1>}, {transform_indices = @transform_1, window_bounds = array<i64: 1, 1>}, {transform_indices = @transform_2, window_bounds = array<i64: 8, 128>}, {transform_indices = @transform_3, window_bounds = array<i64: 8, 128>}]} {
    %c0 = arith.constant 0 : index
    %c0_0 = arith.constant 0 : index
    %0 = memref.load %arg1[%c0, %c0_0] : memref<1x1xf32, #tpu.memory_space<smem>>
    %c0_1 = arith.constant 0 : index
    %c0_2 = arith.constant 0 : index
    %1 = memref.load %arg2[%c0_1, %c0_2] : memref<1x1xf32, #tpu.memory_space<smem>>
    %c0_3 = arith.constant 0 : index
    %c0_4 = arith.constant 0 : index
    %2 = vector.load %arg3[%c0_3, %c0_4] : memref<8x128xf32, #tpu.memory_space<vmem>>, vector<8x128xf32>
    %3 = vector.broadcast %0 : f32 to vector<8x128xf32>
    %4 = arith.mulf %2, %3 : vector<8x128xf32>
    %5 = vector.broadcast %1 : f32 to vector<8x128xf32>
    %6 = arith.addf %4, %5 : vector<8x128xf32>
    %c0_5 = arith.constant 0 : index
    %c0_6 = arith.constant 0 : index
    %7 = vector.load %arg4[%c0_5, %c0_6] : memref<8x128xf32, #tpu.memory_space<vmem>>, vector<8x128xf32>
    tpu.vector_store %arg4[%c0_5, %c0_6], %6 {strides = array<i32>} : memref<8x128xf32, #tpu.memory_space<vmem>>, vector<8x128xf32>,
    return
  }
  func.func @transform_0(%arg0: i32) -> (i32, i32) {
    %c0_i32 = arith.constant 0 : i32
    %c0_i32_0 = arith.constant 0 : i32
    %c0_i32_1 = arith.constant 0 : i32
    return %c0_i32, %c0_i32_0 : i32, i32
  }
  func.func @transform_1(%arg0: i32) -> (i32, i32) {
    %c0_i32 = arith.constant 0 : i32
    %c0_i32_0 = arith.constant 0 : i32
    %c0_i32_1 = arith.constant 0 : i32
    return %c0_i32, %c0_i32_0 : i32, i32
  }
  func.func @transform_2(%arg0: i32) -> (i32, i32) {
    %c0_i32 = arith.constant 0 : i32
    %c0_i32_0 = arith.constant 0 : i32
    return %arg0, %c0_i32 : i32, i32
  }
  func.func @transform_3(%arg0: i32) -> (i32, i32) {
    %c0_i32 = arith.constant 0 : i32
    %c0_i32_0 = arith.constant 0 : i32
    return %arg0, %c0_i32 : i32, i32
  }
}

</mosaic_0001>

<bundles_post_ra>
// kernel: tpu_custom_call.1
= control target key start
LH: loop header
LB: loop body
LE: loop exit
PB: predicated region body
PF: predicated region fallthrough
CT: control target
= control target key end

     0   :  { %10 = vsyncpa [#allocation5], 0  ;;  %s132_s0 = inlined_call_operand.<no memory space> [shape: f32[1,1], index: 0, kind: input, shape index: {}]   ;;  %s133_s1 = inlined_call_operand.<no memory space> [shape: f32[1,1], index: 1, kind: input, shape index: {}]   ;;  %s134_s2 = inlined_call_operand.hbm [shape: f32[8,128], index: 2, kind: input, shape index: {}]   ;;  %s135_s3 = inlined_call_operand.hbm [shape: f32[8,128], index: 3, kind: output, shape index: {}]  }
   0x1   :  { %11 = vsyncpa [#allocation6], 0  ;;  %s98_s12 = smov [#allocation4]  }
   0x2   :  { %s22_s13 = sshll.u32 %s98_s12, 4  ;;  %s23_s13 = int_to_ptr.vmem [resolvable:$true] %s22_s13 }
   0x3   :  { %s62_s14 = scalar_lea.vmem %s23_s13, 128  ;;  %p67_p1 = scmp.lt.s32.totalorder %s23_s13, %s23_s13 }
   0x4   :  { %p63_p0 = scmp.ne.s32.totalorder %s23_s13, %s62_s14  ;;  %p68_p2 = scmp.lt.s32.totalorder %s62_s14, %s62_s14 }
   0x6   :  { %p69_p3 = por %p68_p2, %p67_p1 }
   0x8   :  { %p70_p4 = pnand %p69_p3, %p63_p0 }
   0xa   :  { %73 = shalt.err (!%p70_p4)
}
   0xb   :  { %25 = dma.hbm_to_vmem [thread:$0]  %s134_s2, 128, %s23_s13, [#allocation5]  }
   0xc   :  { %94 = dma.done.wait [#allocation5], 128  }
   0xd   :  { %95 = vsyncadd [#allocation5], 4294967168  ;;  %v32_v0 = vstv %s132_s0  ;;  %v31_v1 = vld [vmem:[#allocation4] sm:$0xff]  ;;  %v34_v2 = vstv %s133_s1  ;;  %s99_s21 = smov [#allocation7]  }
   0xe   :  { %s43_s22 = sshll.u32 %s99_s21, 4  ;;  %v33_v3 = vmul.f32 %v32_v0, %v31_v1  ;;  %s44_s22 = int_to_ptr.vmem [resolvable:$true] %s43_s22 }
   0xf   :  { %s74_s23 = scalar_lea.vmem %s44_s22, 128  ;;  %p79_p6 = scmp.lt.s32.totalorder %s44_s22, %s44_s22 }
  0x10   :  { %v35_v4 = vadd.f32 %v34_v2, %v33_v3  ;;  %p75_p5 = scmp.ne.s32.totalorder %s44_s22, %s74_s23  ;;  %p80_p7 = scmp.lt.s32.totalorder %s74_s23, %s74_s23 }
  0x12   :  { %36 = vst [vmem:[#allocation7] sm:$0xff] %v35_v4  ;;  %p81_p8 = por %p80_p7, %p79_p6 }
  0x14   :  { %p82_p9 = pnand %p81_p8, %p75_p5 }
  0x16   :  { %85 = shalt.err (!%p82_p9)
}
  0x17   :  { %46 = dma.vmem_to_hbm [thread:$0]  %s44_s22, 128, %s135_s3, [#allocation6]  }
  0x18   :  { %96 = dma.done.wait [#allocation6], 128  }
  0x19   :  { %97 = vsyncadd [#allocation6], 4294967168 }
  0x1a   :  { %50 = vsyncpa [#allocation5], 1 }
  0x1b   :  { %51 = vsyncpa [#allocation6], 1 }

</bundles_post_ra>
